<compile_context>
chip_gen: v5e
topology: v5e:2x2
jax: 0.10.0
libtpu: 0.0.40
codegen_flags: <defaults>
</compile_context>

<pallas_src>
import functools

import jax
import jax.numpy as jnp
from jax.experimental import pallas as pl
from jax.experimental.pallas import tpu as pltpu

EPS = 1e-5
NEG_SLOPE = 0.2


def _round_up(x, m):
    return ((x + m - 1) // m) * m


def _convblock_kernel(w_ref, pool_ref, x_ref, o_ref, *, B, H, W, Cout):
    # w_ref:    (K_pad, W*Cout)   matmul dtype  -- kh-folded banded weights
    # pool_ref: (W*Cout, W*Cout)  f32           -- per-channel 0/1 pooling matrix
    # x_ref:    (B*H, K_pad)      matmul dtype  -- im2col-over-kh rows, B images
    # o_ref:    (B*H, W*Cout)     f32           -- lane-dense output
    n_lane = W * Cout
    inv_n = 1.0 / float(H * W)

    # --- Conv: one folded matmul, f32 accumulation --------------------------
    acc = jnp.dot(x_ref[...], w_ref[...],
                  preferred_element_type=jnp.float32)          # (B*H, n_lane)
    # Free sublane split (H % 8 == 0): view as (B, H, n_lane) for per-image stats.
    acc3 = acc.reshape(B, H, n_lane)

    # --- InstanceNorm2d (affine=False, biased var, eps=1e-5) ----------------
    # Per-image row sums (sublane reduce), then per-channel pooling via a tiny
    # MXU matmul against a constant 0/1 matrix -> no lane<->sublane relayouts.
    s1 = jnp.sum(acc3, axis=1)                                  # (B, n_lane)
    s2 = jnp.sum(acc3 * acc3, axis=1)                           # (B, n_lane)
    pool = pool_ref[...]
    mean = inv_n * jnp.dot(s1, pool, preferred_element_type=jnp.float32)
    ex2 = inv_n * jnp.dot(s2, pool, preferred_element_type=jnp.float32)
    var = ex2 - mean * mean                                     # single-pass var (f32)
    inv_std = jax.lax.rsqrt(var + EPS)                          # (B, n_lane)

    y = (acc3 - mean[:, None, :]) * inv_std[:, None, :]

    # --- LeakyReLU(0.2) ------------------------------------------------------
    y = jnp.maximum(y, NEG_SLOPE * y)

    # Dropout2d: identity in eval mode.
    o_ref[...] = y.reshape(B * H, n_lane).astype(o_ref.dtype)


def _make_banded_weight(weight_oihw, W):
    """OIHW (Cout,Cin,3,3) -> (3*(W+2)*Cin, W*Cout) kh-folded banded matrix.

    band[kh*(W+2)*Cin + (w+kw)*Cin + ci, w*Cout + co] = weight[co, ci, kh, kw]
    so that concat_kh(x_pad[h+kh, :, :].ravel()) @ band sums all 9 taps and all
    input channels in a single MXU contraction.
    """
    Cout, Cin, _, _ = weight_oihw.shape
    w_khwc = jnp.transpose(weight_oihw, (2, 3, 1, 0)).astype(jnp.float32)  # (3,3,Cin,Cout)
    eye_w = jnp.eye(W, dtype=jnp.float32)
    bands = []
    for kh in range(3):
        b = jnp.zeros(((W + 2) * Cin, W * Cout), jnp.float32)
        for kw in range(3):
            blk = jnp.kron(eye_w, w_khwc[kh, kw])               # (W*Cin, W*Cout)
            b = b + jnp.pad(blk, ((kw * Cin, (2 - kw) * Cin), (0, 0)))
        bands.append(b)
    return jnp.concatenate(bands, axis=0)                       # (3*(W+2)*Cin, W*Cout)


def _pick_batch_block(N, H, target_rows=256):
    """Largest B dividing N with B*H <= target_rows (MXU-native M on v6e/v7x)."""
    b = max(1, min(N, max(1, target_rows // max(H, 1))))
    while N % b:
        b -= 1
    return b


def conv_block(x_nchw, weight_oihw, *, matmul_dtype=jnp.bfloat16):
    """Forward pass of ConvBlock.

    x_nchw:      (N, Cin, H, W)    float32
    weight_oihw: (Cout, Cin, 3, 3) float32 (PyTorch Conv2d layout)
    returns:     (N, Cout, H, W)   float32
    """
    N, Cin, H, W = x_nchw.shape
    Cout = weight_oihw.shape[0]
    n_lane = W * Cout                       # lane-dense output width (128 here)
    K_raw = 3 * (W + 2) * Cin               # kh-folded contraction size (216 here)
    K_pad = _round_up(K_raw, 128)           # clean MXU fill (256 here)
    B = _pick_batch_block(N, H)             # images per grid step
    M_blk = B * H                           # matmul M per step

    # ---- layout glue (wrapper-side; vanishes in an NHWC pipeline) ----------
    x_nhwc = jnp.transpose(x_nchw, (0, 2, 3, 1))                # (N, H, W, Cin)
    x_pad = jnp.pad(x_nhwc, ((0, 0), (1, 1), (1, 1), (0, 0)))   # (N, H+2, W+2, Cin)
    x_rows = x_pad.reshape(N, H + 2, (W + 2) * Cin)             # row-flattened
    # im2col over kh only: row h = concat(padded rows h, h+1, h+2)
    x_cat = jnp.concatenate([x_rows[:, kh:kh + H, :] for kh in range(3)], axis=-1)
    x_cat = jnp.pad(x_cat, ((0, 0), (0, 0), (0, K_pad - K_raw)))
    x_flat = x_cat.reshape(N * H, K_pad).astype(matmul_dtype)   # (N*H, K_pad)

    w_full = _make_banded_weight(weight_oihw, W)                # (K_raw, n_lane)
    w_full = jnp.pad(w_full, ((0, K_pad - K_raw), (0, 0))).astype(matmul_dtype)

    # Per-channel pooling matrix (0/1): pool[l1, l2] = 1 iff same output channel.
    lane = jnp.arange(n_lane)
    pool = (lane[:, None] % Cout == lane[None, :] % Cout).astype(jnp.float32)

    kernel = functools.partial(_convblock_kernel, B=B, H=H, W=W, Cout=Cout)

    itemsize = jnp.dtype(matmul_dtype).itemsize
    cost = pl.CostEstimate(
        flops=(2 * N * H * W * 9 * Cin * Cout            # conv
               + 2 * 2 * N * n_lane * n_lane             # stats pooling matmuls
               + 10 * N * H * n_lane),                   # norm + activation
        transcendentals=N * Cout,                        # rsqrt per (n, channel)
        bytes_accessed=(N * H * K_pad * itemsize         # input
                        + K_pad * n_lane * itemsize      # banded weights
                        + n_lane * n_lane * 4            # pooling matrix
                        + N * H * n_lane * 4),           # f32 output
    )

    out_flat = pl.pallas_call(
        kernel,
        out_shape=jax.ShapeDtypeStruct((N * H, n_lane), jnp.float32),
        grid_spec=pltpu.PrefetchScalarGridSpec(
            num_scalar_prefetch=0,
            grid=(N // B,),
            in_specs=[
                pl.BlockSpec((K_pad, n_lane), lambda i: (0, 0)),   # banded weights
                pl.BlockSpec((n_lane, n_lane), lambda i: (0, 0)),  # pooling matrix
                pl.BlockSpec((M_blk, K_pad), lambda i: (i, 0)),    # B images of rows
            ],
            out_specs=pl.BlockSpec((M_blk, n_lane), lambda i: (i, 0)),
        ),
        compiler_params=pltpu.CompilerParams(
            dimension_semantics=("parallel",),       # batch-block axis shards across TCs
            vmem_limit_bytes=32 * 1024 * 1024,
        ),
        cost_estimate=cost,
    )(w_full, pool, x_flat)

    out_nhwc = out_flat.reshape(N, H, W, Cout)       # contiguous reshape
    return jnp.transpose(out_nhwc, (0, 3, 1, 2))     # back to NCHW


def _reference(x_nchw, weight_oihw):
    """Pure-JAX reference (conv -> instance norm -> leaky relu)."""
    y = jax.lax.conv_general_dilated(
        x_nchw, weight_oihw,
        window_strides=(1, 1), padding=((1, 1), (1, 1)),
        dimension_numbers=("NCHW", "OIHW", "NCHW"),
        precision=jax.lax.Precision.HIGHEST,
    )
    mean = jnp.mean(y, axis=(2, 3), keepdims=True)
    var = jnp.mean((y - mean) ** 2, axis=(2, 3), keepdims=True)
    y = (y - mean) * jax.lax.rsqrt(var + EPS)
    return jnp.where(y >= 0.0, y, NEG_SLOPE * y)


if __name__ == "__main__":
    key = jax.random.PRNGKey(0)
    k_x, k_w = jax.random.split(key)

    N, Cin, Cout, H, W = 2, 4, 8, 16, 16
    dropout = 0.1  # unused at inference

    x = jax.random.normal(k_x, (N, Cin, H, W), dtype=jnp.float32)
    # Deterministic Conv2d-like weight init (kaiming-uniform scale), OIHW layout.
    fan_in = Cin * 3 * 3
    bound = (1.0 / fan_in) ** 0.5
    w = jax.random.uniform(k_w, (Cout, Cin, 3, 3), dtype=jnp.float32,
                           minval=-bound, maxval=bound)

    ref = _reference(x, w)

    # f32 operand path: tight check of the folded-conv + norm algorithm.
    out_f32 = jax.block_until_ready(conv_block(x, w, matmul_dtype=jnp.float32))
    assert out_f32.shape == (N, Cout, H, W)
    err_f32 = float(jnp.max(jnp.abs(out_f32 - ref)))
    assert err_f32 < 5e-3, err_f32

    # Default bf16-operand / f32-accumulate path (MXU-friendly): looser tolerance
    # since conv inputs/weights are rounded to bf16 before InstanceNorm.
    out_bf16 = jax.block_until_ready(conv_block(x, w))
    assert out_bf16.shape == (N, Cout, H, W)
    err_bf16 = float(jnp.max(jnp.abs(out_bf16 - ref)))
    assert err_bf16 < 2e-1, err_bf16

    print("KERNEL_OK")
</pallas_src>

<mosaic_0001>
module attributes {stable_mosaic.version = 11 : i64} {
  func.func @_convblock_kernel(%arg0: i32, %arg1: memref<256x128xf32, #tpu.memory_space<vmem>>, %arg2: memref<128x128xf32, #tpu.memory_space<vmem>>, %arg3: memref<32x256xf32, #tpu.memory_space<vmem>>, %arg4: memref<32x128xf32, #tpu.memory_space<vmem>>) attributes {dimension_semantics = [#tpu.dimension_semantics<parallel>], iteration_bounds = array<i64: 1>, scalar_prefetch = 0 : i64, scratch_operands = 0 : i64, tpu.core_type = #tpu.core_type<tc>, window_params = [{pipeline_mode = #tpu.pipeline_mode<synchronous>, transform_indices = @transform_0, window_bounds = array<i64: 256, 128>}, {pipeline_mode = #tpu.pipeline_mode<synchronous>, transform_indices = @transform_1, window_bounds = array<i64: 128, 128>}, {transform_indices = @transform_2, window_bounds = array<i64: 32, 256>}, {transform_indices = @transform_3, window_bounds = array<i64: 32, 128>}]} {
    %c0 = arith.constant 0 : index
    %c0_0 = arith.constant 0 : index
    %0 = vector.load %arg3[%c0, %c0_0] : memref<32x256xf32, #tpu.memory_space<vmem>>, vector<32x256xf32>
    %c0_1 = arith.constant 0 : index
    %c0_2 = arith.constant 0 : index
    %1 = vector.load %arg1[%c0_1, %c0_2] : memref<256x128xf32, #tpu.memory_space<vmem>>, vector<256x128xf32>
    %cst = arith.constant dense<0.000000e+00> : vector<32x128xf32>
    %2 = tpu.matmul %0, %1, %cst {dimension_numbers = #tpu.dot_dimension_numbers<[1], [0], [0], [1], [0, 0, 1, 1], [], []>} : vector<32x256xf32>, vector<256x128xf32>, vector<32x128xf32> -> vector<32x128xf32>
    %3 = vector.shape_cast %2 : vector<32x128xf32> to vector<2x16x128xf32>
    %cst_3 = arith.constant dense<0.000000e+00> : vector<2x128xf32>
    %4 = vector.multi_reduction <add>, %3, %cst_3 [1] : vector<2x16x128xf32> to vector<2x128xf32>
    %5 = arith.mulf %3, %3 : vector<2x16x128xf32>
    %cst_4 = arith.constant dense<0.000000e+00> : vector<2x128xf32>
    %6 = vector.multi_reduction <add>, %5, %cst_4 [1] : vector<2x16x128xf32> to vector<2x128xf32>
    %c0_5 = arith.constant 0 : index
    %c0_6 = arith.constant 0 : index
    %7 = vector.load %arg2[%c0_5, %c0_6] : memref<128x128xf32, #tpu.memory_space<vmem>>, vector<128x128xf32>
    %cst_7 = arith.constant dense<0.000000e+00> : vector<2x128xf32>
    %8 = tpu.matmul %4, %7, %cst_7 {dimension_numbers = #tpu.dot_dimension_numbers<[1], [0], [0], [1], [0, 0, 1, 1], [], []>} : vector<2x128xf32>, vector<128x128xf32>, vector<2x128xf32> -> vector<2x128xf32>
    %cst_8 = arith.constant 3.906250e-03 : f32
    %9 = vector.broadcast %cst_8 : f32 to vector<2x128xf32>
    %10 = arith.mulf %9, %8 : vector<2x128xf32>
    %cst_9 = arith.constant dense<0.000000e+00> : vector<2x128xf32>
    %11 = tpu.matmul %6, %7, %cst_9 {dimension_numbers = #tpu.dot_dimension_numbers<[1], [0], [0], [1], [0, 0, 1, 1], [], []>} : vector<2x128xf32>, vector<128x128xf32>, vector<2x128xf32> -> vector<2x128xf32>
    %cst_10 = arith.constant 3.906250e-03 : f32
    %12 = vector.broadcast %cst_10 : f32 to vector<2x128xf32>
    %13 = arith.mulf %12, %11 : vector<2x128xf32>
    %14 = arith.mulf %10, %10 : vector<2x128xf32>
    %15 = arith.subf %13, %14 : vector<2x128xf32>
    %cst_11 = arith.constant 9.99999974E-6 : f32
    %16 = vector.broadcast %cst_11 : f32 to vector<2x128xf32>
    %17 = arith.addf %15, %16 : vector<2x128xf32>
    %18 = math.rsqrt %17 : vector<2x128xf32>
    %19 = vector.shape_cast %10 : vector<2x128xf32> to vector<2x1x128xf32>
    %20 = vector.broadcast %19 : vector<2x1x128xf32> to vector<2x16x128xf32>
    %21 = arith.subf %3, %20 : vector<2x16x128xf32>
    %22 = vector.shape_cast %18 : vector<2x128xf32> to vector<2x1x128xf32>
    %23 = vector.broadcast %22 : vector<2x1x128xf32> to vector<2x16x128xf32>
    %24 = arith.mulf %21, %23 : vector<2x16x128xf32>
    %cst_12 = arith.constant 2.000000e-01 : f32
    %25 = vector.broadcast %cst_12 : f32 to vector<2x16x128xf32>
    %26 = arith.mulf %25, %24 : vector<2x16x128xf32>
    %27 = arith.maximumf %24, %26 : vector<2x16x128xf32>
    %28 = vector.shape_cast %27 : vector<2x16x128xf32> to vector<32x128xf32>
    %c0_13 = arith.constant 0 : index
    %c0_14 = arith.constant 0 : index
    %29 = vector.load %arg4[%c0_13, %c0_14] : memref<32x128xf32, #tpu.memory_space<vmem>>, vector<32x128xf32>
    tpu.vector_store %arg4[%c0_13, %c0_14], %28 {strides = array<i32>} : memref<32x128xf32, #tpu.memory_space<vmem>>, vector<32x128xf32>,
    return
  }
  func.func @transform_0(%arg0: i32) -> (i32, i32) {
    %c0_i32 = arith.constant 0 : i32
    %c0_i32_0 = arith.constant 0 : i32
    %c0_i32_1 = arith.constant 0 : i32
    return %c0_i32, %c0_i32_0 : i32, i32
  }
  func.func @transform_1(%arg0: i32) -> (i32, i32) {
    %c0_i32 = arith.constant 0 : i32
    %c0_i32_0 = arith.constant 0 : i32
    %c0_i32_1 = arith.constant 0 : i32
    return %c0_i32, %c0_i32_0 : i32, i32
  }
  func.func @transform_2(%arg0: i32) -> (i32, i32) {
    %c0_i32 = arith.constant 0 : i32
    %c0_i32_0 = arith.constant 0 : i32
    return %arg0, %c0_i32 : i32, i32
  }
  func.func @transform_3(%arg0: i32) -> (i32, i32) {
    %c0_i32 = arith.constant 0 : i32
    %c0_i32_0 = arith.constant 0 : i32
    return %arg0, %c0_i32 : i32, i32
  }
}

</mosaic_0001>

<bundles_post_ra>
// kernel: tpu_custom_call.1
= control target key start
LH: loop header
LB: loop body
LE: loop exit
PB: predicated region body
PF: predicated region fallthrough
CT: control target
= control target key end

     0   :  { %8 = vsyncpa [#allocation3], 0  ;;  %s509_s0 = inlined_call_operand.hbm [shape: f32[256,128], index: 0, kind: input, shape index: {}]   ;;  %s510_s1 = inlined_call_operand.hbm [shape: f32[128,128], index: 1, kind: input, shape index: {}]   ;;  %s511_s2 = inlined_call_operand.hbm [shape: f32[32,256], index: 2, kind: input, shape index: {}]   ;;  %s512_s3 = inlined_call_operand.hbm [shape: f32[32,128], index: 3, kind: output, shape index: {}]  }
   0x1   :  { %9 = vsyncpa [#allocation6], 0 }
   0x2   :  { %10 = vsyncpa [#allocation4], 0  ;;  %s28_s14 = sshll.u32 %s510_s1, 4  ;;  %s436_s15 = smov [#allocation5]   ;;  %s29_s14 = int_to_ptr.hbm [resolvable:$true] %s28_s14 }
   0x3   :  { %s30_s16 = sshll.u32 %s436_s15, 4  ;;  %s15_s19 = sshll.u32 %s509_s0, 4  ;;  %s31_s16 = int_to_ptr.vmem [resolvable:$true] %s30_s16  ;;  %s16_s19 = int_to_ptr.hbm [resolvable:$true] %s15_s19 }
   0x4   :  { %s437_s20 = smov 128   ;;  %s438_s21 = smov 8  }
   0x5   :  { %36 = dma.hbm_to_vmem [thread:$0]  %s29_s14, 2048, %s31_s16, [#allocation6], %s437_s20, %s437_s20, %s438_s21  }
   0x6   :  { %s439_s22 = smov [#allocation2]   ;;  %s41_s1 = sshll.u32 %s511_s2, 4  ;;  %s42_s1 = int_to_ptr.hbm [resolvable:$true] %s41_s1 }
   0x7   :  { %s17_s23 = sshll.u32 %s439_s22, 4  ;;  %s440_s0 = smov [#allocation7]   ;;  %s18_s23 = int_to_ptr.vmem [resolvable:$true] %s17_s23 }
   0x8   :  { %23 = dma.hbm_to_vmem [thread:$0]  %s16_s19, 4096, %s18_s23, [#allocation3], %s437_s20, %s437_s20, %s438_s21  }
   0x9   :  { %s43_s26 = sshll.u32 %s440_s0, 4  ;;  %s441_s27 = smov 256   ;;  %s44_s26 = int_to_ptr.vmem [resolvable:$true] %s43_s26 }
   0xa   :  { %s442_s28 = smov 16  }
   0xb   :  { %49 = dma.hbm_to_vmem [thread:$0]  %s42_s1, 1024, %s44_s26, [#allocation6], %s441_s27, %s441_s27, %s442_s28  }
   0xc   :  { %430 = dma.done.wait [#allocation3], 4096  }
   0xd   :  { %431 = vsyncadd [#allocation3], 4294963200 }
   0xe   :  { %432 = dma.done.wait [#allocation6], 3072  }
   0xf   :  { %433 = vsyncadd [#allocation6], 4294964224  ;;  %v85_v0 = vld [vmem:[#allocation2 + $0x78] sm:$0xff]  ;;  %v84_v2 = vld [vmem:[#allocation2 + $0x70] sm:$0xff]  ;;  %vm210_vm0 = vcmask 1041409   ;;  %s443_s2 = smov [#allocation8]  }
  0x10   :  { %v101_v1 = vld [vmem:[#allocation2 + $0xf8] sm:$0xff]  ;;  %102 = vmatpush.msra.mxu0 %v85_v0  ;;  %v100_v3 = vld [vmem:[#allocation2 + $0xf0] sm:$0xff]  ;;  %v83_v4 = vld [vmem:[#allocation2 + $0x68] sm:$0xff]  ;;  %s308_s29 = sshll.u32 %s443_s2, 4  ;;  %s310_s5 = sshll.u32 %s512_s3, 4  ;;  %s309_s29 = int_to_ptr.vmem [resolvable:$true] %s308_s29  ;;  %s311_s5 = int_to_ptr.hbm [resolvable:$true] %s310_s5 }
  0x11   :  { %131 = vmatpush.msra.mxu1 %v101_v1  ;;  %v99_v5 = vld [vmem:[#allocation2 + $0xe8] sm:$0xff]  ;;  %v82_v6 = vld [vmem:[#allocation2 + $0x60] sm:$0xff]  ;;  %v81_v8 = vld [vmem:[#allocation2 + $0x58] sm:$0xff] }
  0x12   :  { %103 = vmatpush.msra.mxu0 %v84_v2  ;;  %v98_v7 = vld [vmem:[#allocation2 + $0xe0] sm:$0xff]  ;;  %v97_v9 = vld [vmem:[#allocation2 + $0xd8] sm:$0xff]  ;;  %v80_v10 = vld [vmem:[#allocation2 + $0x50] sm:$0xff] }
  0x13   :  { %132 = vmatpush.msra.mxu1 %v100_v3  ;;  %v96_v11 = vld [vmem:[#allocation2 + $0xd0] sm:$0xff]  ;;  %v79_v12 = vld [vmem:[#allocation2 + $0x48] sm:$0xff]  ;;  %v78_v14 = vld [vmem:[#allocation2 + $0x40] sm:$0xff] }
  0x14   :  { %104 = vmatpush.msra.mxu0 %v83_v4  ;;  %v95_v13 = vld [vmem:[#allocation2 + $0xc8] sm:$0xff]  ;;  %v94_v15 = vld [vmem:[#allocation2 + $0xc0] sm:$0xff]  ;;  %v77_v16 = vld [vmem:[#allocation2 + $0x38] sm:$0xff] }
  0x15   :  { %133 = vmatpush.msra.mxu1 %v99_v5  ;;  %v93_v17 = vld [vmem:[#allocation2 + $0xb8] sm:$0xff]  ;;  %v76_v18 = vld [vmem:[#allocation2 + $0x30] sm:$0xff]  ;;  %v75_v20 = vld [vmem:[#allocation2 + $0x28] sm:$0xff] }
  0x16   :  { %105 = vmatpush.msra.mxu0 %v82_v6  ;;  %v92_v19 = vld [vmem:[#allocation2 + $0xb0] sm:$0xff]  ;;  %v91_v21 = vld [vmem:[#allocation2 + $0xa8] sm:$0xff]  ;;  %v74_v22 = vld [vmem:[#allocation2 + $0x20] sm:$0xff] }
  0x17   :  { %134 = vmatpush.msra.mxu1 %v98_v7  ;;  %v90_v23 = vld [vmem:[#allocation2 + $0xa0] sm:$0xff]  ;;  %v73_v24 = vld [vmem:[#allocation2 + $0x18] sm:$0xff]  ;;  %v72_v26 = vld [vmem:[#allocation2 + $0x10] sm:$0xff] }
  0x18   :  { %106 = vmatpush.msra.mxu0 %v81_v8  ;;  %v89_v25 = vld [vmem:[#allocation2 + $0x98] sm:$0xff]  ;;  %v88_v27 = vld [vmem:[#allocation2 + $0x90] sm:$0xff]  ;;  %v71_v28 = vld [vmem:[#allocation2 + $0x8] sm:$0xff] }
  0x19   :  { %135 = vmatpush.msra.mxu1 %v97_v9  ;;  %v87_v29 = vld [vmem:[#allocation2 + $0x88] sm:$0xff]  ;;  %v70_v30 = vld [vmem:[#allocation2] sm:$0xff]  ;;  %v64_v34 = vld [vmem:[#allocation7 + $0x10] sm:$0xff] }
  0x1a   :  { %107 = vmatpush.msra.mxu0 %v80_v10  ;;  %v86_v31 = vld [vmem:[#allocation2 + $0x80] sm:$0xff]  ;;  %v63_v33 = vld [vmem:[#allocation7 + $0x8] sm:$0xff]  ;;  %v65_v35 = vld [vmem:[#allocation7 + $0x18] sm:$0xff] }
  0x1b   :  { %136 = vmatpush.msra.mxu1 %v96_v11  ;;  %v62_v32 = vld [vmem:[#allocation7] sm:$0xff]  ;;  %v67_v37 = vld [vmem:[#allocation7 + $0x28] sm:$0xff]  ;;  %v68_v38 = vld [vmem:[#allocation7 + $0x30] sm:$0xff] }
  0x1c   :  { %108 = vmatpush.msra.mxu0 %v79_v12  ;;  %v66_v36 = vld [vmem:[#allocation7 + $0x20] sm:$0xff]  ;;  %v69_v39 = vld [vmem:[#allocation7 + $0x38] sm:$0xff]  ;;  %v206_v41 = vld [vmem:[#allocation5 + $0x70] sm:$0xff] }
  0x1d   :  { %137 = vmatpush.msra.mxu1 %v95_v13  ;;  %v207_v40 = vld [vmem:[#allocation5 + $0x78] sm:$0xff]  ;;  %v205_v42 = vld [vmem:[#allocation5 + $0x68] sm:$0xff]  ;;  %v204_v43 = vld [vmem:[#allocation5 + $0x60] sm:$0xff] }
  0x1e   :  { %109 = vmatpush.msra.mxu0 %v78_v14  ;;  %213 = vmatpush.msra.mxu2 %v207_v40  ;;  %v203_v44 = vld [vmem:[#allocation5 + $0x58] sm:$0xff]  ;;  %v202_v45 = vld [vmem:[#allocation5 + $0x50] sm:$0xff]  ;;  %v201_v46 = vld [vmem:[#allocation5 + $0x48] sm:$0xff] }
  0x1f   :  { %138 = vmatpush.msra.mxu1 %v94_v15  ;;  %238 = vmatpush.msra.mxu3 %v207_v40  ;;  %v200_v47 = vld [vmem:[#allocation5 + $0x40] sm:$0xff]  ;;  %v199_v48 = vld [vmem:[#allocation5 + $0x38] sm:$0xff]  ;;  %v198_v49 = vld [vmem:[#allocation5 + $0x30] sm:$0xff] }
  0x20   :  { %110 = vmatpush.msra.mxu0 %v77_v16  ;;  %214 = vmatpush.msra.mxu2 %v206_v41  ;;  %v197_v50 = vld [vmem:[#allocation5 + $0x28] sm:$0xff]  ;;  %v196_v51 = vld [vmem:[#allocation5 + $0x20] sm:$0xff]  ;;  %v195_v54 = vld [vmem:[#allocation5 + $0x18] sm:$0xff] }
  0x21   :  { %139 = vmatpush.msra.mxu1 %v93_v17  ;;  %239 = vmatpush.msra.mxu3 %v206_v41  ;;  %v194_v55 = vld [vmem:[#allocation5 + $0x10] sm:$0xff]  ;;  %v193_v56 = vld [vmem:[#allocation5 + $0x8] sm:$0xff]  ;;  %v192_v57 = vld [vmem:[#allocation5] sm:$0xff] }
  0x22   :  { %111 = vmatpush.msra.mxu0 %v76_v18  ;;  %215 = vmatpush.msra.mxu2 %v205_v42 }
  0x23   :  { %140 = vmatpush.msra.mxu1 %v92_v19  ;;  %240 = vmatpush.msra.mxu3 %v205_v42 }
  0x24   :  { %112 = vmatpush.msra.mxu0 %v75_v20  ;;  %216 = vmatpush.msra.mxu2 %v204_v43 }
  0x25   :  { %141 = vmatpush.msra.mxu1 %v91_v21  ;;  %241 = vmatpush.msra.mxu3 %v204_v43 }
  0x26   :  { %113 = vmatpush.msra.mxu0 %v74_v22  ;;  %217 = vmatpush.msra.mxu2 %v203_v44 }
  0x27   :  { %142 = vmatpush.msra.mxu1 %v90_v23  ;;  %242 = vmatpush.msra.mxu3 %v203_v44 }
  0x28   :  { %114 = vmatpush.msra.mxu0 %v73_v24  ;;  %218 = vmatpush.msra.mxu2 %v202_v45 }
  0x29   :  { %143 = vmatpush.msra.mxu1 %v89_v25  ;;  %243 = vmatpush.msra.mxu3 %v202_v45 }
  0x2a   :  { %115 = vmatpush.msra.mxu0 %v72_v26  ;;  %219 = vmatpush.msra.mxu2 %v201_v46 }
  0x2b   :  { %144 = vmatpush.msra.mxu1 %v88_v27  ;;  %244 = vmatpush.msra.mxu3 %v201_v46 }
  0x2c   :  { %116 = vmatpush.msra.mxu0 %v71_v28  ;;  %220 = vmatpush.msra.mxu2 %v200_v47 }
  0x2d   :  { %145 = vmatpush.msra.mxu1 %v87_v29  ;;  %245 = vmatpush.msra.mxu3 %v200_v47 }
  0x2e   :  { %117 = vmatpush.msra.mxu0 %v70_v30  ;;  %221 = vmatpush.msra.mxu2 %v199_v48 }
  0x2f   :  { %146 = vmatpush.msra.mxu1 %v86_v31  ;;  %118 = vmatmul.f32.vlgmr.msra.gmra.mxu0 %v62_v32 }
  0x30   :  { %147 = vmatmul.f32.vlgmr.msra.gmra.mxu1 %v63_v33  ;;  %246 = vmatpush.msra.mxu3 %v199_v48 }
  0x31   :  { %222 = vmatpush.msra.mxu2 %v198_v49 }
  0x32   :  { %247 = vmatpush.msra.mxu3 %v198_v49 }
  0x33   :  { %223 = vmatpush.msra.mxu2 %v197_v50 }
  0x34   :  { %248 = vmatpush.msra.mxu3 %v197_v50 }
  0x35   :  { %224 = vmatpush.msra.mxu2 %v196_v51 }
  0x36   :  { %249 = vmatpush.msra.mxu3 %v196_v51 }
  0x37   :  { %121 = vmatmul.f32.gmra.mxu0 %v64_v34  ;;  %225 = vmatpush.msra.mxu2 %v195_v54 }
  0x38   :  { %150 = vmatmul.f32.gmra.mxu1 %v65_v35  ;;  %250 = vmatpush.msra.mxu3 %v195_v54 }
  0x39   :  { %226 = vmatpush.msra.mxu2 %v194_v55 }
  0x3a   :  { %251 = vmatpush.msra.mxu3 %v194_v55 }
  0x3b   :  { %227 = vmatpush.msra.mxu2 %v193_v56 }
  0x3c   :  { %252 = vmatpush.msra.mxu3 %v193_v56 }
  0x3d   :  { %228 = vmatpush.msra.mxu2 %v192_v57 }
  0x3e   :  { %253 = vmatpush.msra.mxu3 %v192_v57 }
  0x3f   :  { %124 = vmatmul.f32.gmra.mxu0 %v66_v36 }
  0x40   :  { %153 = vmatmul.f32.gmra.mxu1 %v67_v37 }
  0x47   :  { %127 = vmatmul.f32.gmra.mxu0 %v68_v38 }
  0x48   :  { %156 = vmatmul.f32.gmra.mxu1 %v69_v39 }
  0xac   :  { %v119_v52 = vpop.f32.mrf.mxu0 }
  0xad   :  { %v148_v53 = vpop.f32.mrf.mxu1 }
  0xae   :  { %v481_v61 = vadd.f32 %v148_v53, %v119_v52 }
  0xb0   :  { %v174_v63 = vmul.f32 %v481_v61, %v481_v61 }
  0xb4   :  { %v122_v58 = vpop.f32.mrf.mxu0 }
  0xb5   :  { %v151_v59 = vpop.f32.mrf.mxu1 }
  0xb6   :  { %v479_v60 = vadd.f32 %v151_v59, %v122_v58 }
  0xb8   :  { %v175_v62 = vmul.f32 %v479_v60, %v479_v60  ;;  %v160_v0 = vadd.f32 %v479_v60, %v481_v61 }
  0xba   :  { %v178_v3 = vadd.f32 %v175_v62, %v174_v63  ;;  %v161_v4 = vrot.slane %v160_v0, 4 }
  0xbc   :  { %v125_v1 = vpop.f32.mrf.mxu0  ;;  %v179_v5 = vrot.slane %v178_v3, 4  ;;  %v162_v6 = vadd.f32 %v161_v4, %v160_v0 }
  0xbd   :  { %v154_v2 = vpop.f32.mrf.mxu1 }
  0xbe   :  { %v489_v7 = vadd.f32 %v154_v2, %v125_v1  ;;  %v180_v11 = vadd.f32 %v179_v5, %v178_v3  ;;  %v163_v15 = vrot.slane %v162_v6, 2 }
  0xc0   :  { %v176_v12 = vmul.f32 %v489_v7, %v489_v7  ;;  %v181_v18 = vrot.slane %v180_v11, 2  ;;  %v164_v21 = vadd.f32 %v163_v15, %v162_v6 }
  0xc2   :  { %v182_v23 = vadd.f32 %v181_v18, %v180_v11  ;;  %v165_v25 = vrot.slane %v164_v21, 1 }
  0xc4   :  { %v128_v8 = vpop.f32.mrf.mxu0  ;;  %v183_v29 = vrot.slane %v182_v23, 1  ;;  %v166_v31 = vadd.f32 %v165_v25, %v164_v21 }
  0xc5   :  { %v157_v9 = vpop.f32.mrf.mxu1 }
  0xc6   :  { %v491_v10 = vadd.f32 %v157_v9, %v128_v8  ;;  %v184_v35 = vadd.f32 %v183_v29, %v182_v23 }
  0xc8   :  { %v167_v13 = vadd.f32 %v491_v10, %v489_v7  ;;  %v177_v14 = vmul.f32 %v491_v10, %v491_v10 }
  0xca   :  { %v168_v16 = vrot.slane %v167_v13, 4  ;;  %v185_v17 = vadd.f32 %v177_v14, %v176_v12 }
  0xcc   :  { %v169_v19 = vadd.f32 %v168_v16, %v167_v13  ;;  %v186_v20 = vrot.slane %v185_v17, 4 }
  0xce   :  { %v170_v22 = vrot.slane %v169_v19, 2  ;;  %v187_v24 = vadd.f32 %v186_v20, %v185_v17 }
  0xd0   :  { %v171_v26 = vadd.f32 %v170_v22, %v169_v19  ;;  %v188_v27 = vrot.slane %v187_v24, 2 }
  0xd2   :  { %v172_v28 = vrot.slane %v171_v26, 1  ;;  %v189_v30 = vadd.f32 %v188_v27, %v187_v24 }
  0xd4   :  { %v173_v32 = vadd.f32 %v172_v28, %v171_v26  ;;  %v190_v33 = vrot.slane %v189_v30, 1 }
  0xd6   :  { %v211_v34 = vsel %vm210_vm0, %v173_v32, %v166_v31  ;;  %v191_v36 = vadd.f32 %v190_v33, %v189_v30 }
  0xd7   :  { %229 = vmatmul.f32.vlgmr.msra.gmra.mxu2 %v211_v34 }
  0xd8   :  { %v236_v37 = vsel %vm210_vm0, %v191_v36, %v184_v35 }
  0xd9   :  { %254 = vmatmul.f32.vlgmr.msra.gmra.mxu3 %v236_v37 }
 0x15a   :  { %v230_v38 = vpop.f32.mrf.mxu2 }
 0x15b   :  { %v233_v39 = vmul.f32 0.00390625, %v230_v38 }
 0x15c   :  { %v255_v40 = vpop.f32.mrf.mxu3 }
 0x15d   :  { %v258_v41 = vmul.f32 0.00390625, %v255_v40  ;;  %v259_v42 = vmul.f32 %v233_v39, %v233_v39  ;;  %v273_v48 = vrot.slane %v233_v39, 1  ;;  %v274_v51 = vperm.slane %v233_v39, 0 }
 0x15f   :  { %v260_v43 = vsub.f32 %v258_v41, %v259_v42  ;;  %v275_v52 = vperm.slane %v273_v48, 0  ;;  %v278_v55 = vsub.f32 %v481_v61, %v274_v51  ;;  %v279_v56 = vsub.f32 %v479_v60, %v274_v51 }
 0x161   :  { %v261_v44 = vadd.f32 1e-05, %v260_v43  ;;  %v280_v59 = vsub.f32 %v489_v7, %v275_v52  ;;  %v281_v62 = vsub.f32 %v491_v10, %v275_v52 }
 0x163   :  { %332 = vrsqrt.f32 %v261_v44  ;;  %vm268_vm2 = vweird.f32 %v261_v44 }
 0x169   :  { %v333_v45 = vpop.eup %332 }
 0x16a   :  { %v263_v46 = vmul.f32 %v333_v45, %v261_v44  ;;  %vm269_vm1 = vweird.f32 %v333_v45 }
 0x16b   :  { %vm270_vm3 = vmor %vm268_vm2, %vm269_vm1 }
 0x16c   :  { %v264_v47 = vmul.f32 %v333_v45, %v263_v46 }
 0x16e   :  { %v265_v49 = vmul.f32 0.5, %v264_v47 }
 0x170   :  { %v266_v50 = vsub.f32 1.5, %v265_v49 }
 0x172   :  { %v267_v53 = vmul.f32 %v333_v45, %v266_v50 }
 0x174   :  { %v271_v54 = vsel %vm270_vm3, %v333_v45, %v267_v53 }
 0x175   :  { %v283_v57 = vrot.slane %v271_v54, 1  ;;  %v284_v58 = vperm.slane %v271_v54, 0 }
 0x177   :  { %v285_v63 = vperm.slane %v283_v57, 0  ;;  %v288_v0 = vmul.f32 %v284_v58, %v278_v55  ;;  %v289_v1 = vmul.f32 %v284_v58, %v279_v56 }
 0x179   :  { %v290_v2 = vmul.f32 %v285_v63, %v280_v59  ;;  %v291_v3 = vmul.f32 %v285_v63, %v281_v62  ;;  %v292_v4 = vmul.f32 0.2, %v288_v0  ;;  %v293_v5 = vmul.f32 0.2, %v289_v1 }
 0x17b   :  { %v294_v6 = vmul.f32 0.2, %v290_v2  ;;  %v295_v8 = vmul.f32 0.2, %v291_v3  ;;  %v296_v9 = vmax.f32 %v288_v0, %v292_v4  ;;  %v297_v11 = vmax.f32 %v289_v1, %v293_v5 }
 0x17d   :  { %v298_v60 = vmax.f32 %v290_v2, %v294_v6  ;;  %v299_v61 = vmax.f32 %v291_v3, %v295_v8  ;;  %300 = vst [vmem:[#allocation8] sm:$0xff] %v296_v9 }
 0x17e   :  { %301 = vst [vmem:[#allocation8 + $0x8] sm:$0xff] %v297_v11 }
 0x17f   :  { %302 = vst [vmem:[#allocation8 + $0x10] sm:$0xff] %v298_v60 }
 0x180   :  { %303 = vst [vmem:[#allocation8 + $0x18] sm:$0xff] %v299_v61 }
 0x181   :  { %316 = dma.vmem_to_hbm [thread:$0]  %s309_s29, 512, %s311_s5, [#allocation4], %s437_s20, %s437_s20, %s438_s21  }
 0x182   :  { %434 = dma.done.wait [#allocation4], 512  }
 0x183   :  { %435 = vsyncadd [#allocation4], 4294966784 }
 0x184   :  { %321 = vsyncpa [#allocation3], 1 }
 0x185   :  { %322 = vsyncpa [#allocation6], 1 }
 0x186   :  { %323 = vsyncpa [#allocation4], 1 }

</bundles_post_ra>
